<compile_context>
chip_gen: v5e
topology: v5e:2x2
jax: 0.10.0
libtpu: 0.0.40
codegen_flags: <defaults>
</compile_context>

<pallas_src>
import functools

import jax
import jax.numpy as jnp
from jax.experimental import pallas as pl
from jax.experimental.pallas import tpu as pltpu


def _round_up(n, m):
    return ((n + m - 1) // m) * m


def _cdiv(a, b):
    return (a + b - 1) // b


def _tpu_vmem_capacity_bytes(default=64 << 20):
    """Physical VMEM per TensorCore; conservative (v7x-sized) fallback."""
    try:
        info = pltpu.get_tpu_info()
        cap = getattr(info, "vmem_capacity_bytes", None)
        if cap:
            return int(cap)
    except Exception:
        pass
    return default


# ----------------------------- kernel body -----------------------------------
def _adapter_kernel(x_ref, w1_ref, b1_ref, w2_ref, b2_ref, o_ref, *, apply_relu):
    # x_ref : (tm, idim)          row tile of the input
    # w1_ref: (idim, hidden_pad)  full W1^T (hidden lane-padded), resident
    # b1_ref: (1, hidden_pad)     f32
    # w2_ref: (hidden_pad, idim)  full W2^T, resident
    # b2_ref: (1, idim)           f32
    # o_ref : (tm, idim)
    op_dtype = w1_ref.dtype                       # MXU operand dtype (f32 or bf16)
    x = x_ref[...].astype(op_dtype)
    h = jnp.dot(x, w1_ref[...], preferred_element_type=jnp.float32) + b1_ref[...]
    out = jnp.dot(h.astype(op_dtype), w2_ref[...],
                  preferred_element_type=jnp.float32) + b2_ref[...]
    if apply_relu:
        out = jnp.maximum(out, 0.0)
    o_ref[...] = out.astype(o_ref.dtype)


# ----------------------------- parameter prep --------------------------------
def prepare_adapter_params(w1, b1, w2, b2, *, param_dtype=None):
    """Transpose + lane-pad the adapter weights ONCE (hoisted off the call path).

    w1: (idim//4, idim), b1: (idim//4,), w2: (idim, idim//4), b2: (idim,).
    param_dtype: optional MXU operand dtype for the weights (e.g. jnp.bfloat16)
    to halve resident weight VMEM and keep the kernel cleanly HBM-bound.
    """
    hidden, idim = w1.shape
    hidden_pad = max(128, _round_up(hidden, 128))
    wdt = w1.dtype if param_dtype is None else param_dtype

    w1_t = jnp.zeros((idim, hidden_pad), wdt).at[:, :hidden].set(w1.T.astype(wdt))
    w2_t = jnp.zeros((hidden_pad, idim), wdt).at[:hidden, :].set(w2.T.astype(wdt))
    # Biases are added to the f32 accumulator -> keep them in f32.
    b1_2d = jnp.zeros((1, hidden_pad), jnp.float32).at[:, :hidden].set(
        b1.astype(jnp.float32))
    b2_2d = b2.astype(jnp.float32).reshape(1, idim)
    return {"idim": idim, "hidden_pad": hidden_pad,
            "w1_t": w1_t, "b1": b1_2d, "w2_t": w2_t, "b2": b2_2d}


# ------------------------------- main entry -----------------------------------
def adapter_single_prepared(x, params, *, mean_var="mean", tm=None,
                            vmem_budget_bytes=None):
    """x: (..., idim); params from prepare_adapter_params()."""
    idim = params["idim"]
    hidden_pad = params["hidden_pad"]
    assert x.shape[-1] == idim
    orig_shape = x.shape
    x2d = x.reshape(-1, idim)
    M = x2d.shape[0]

    act_bytes = x2d.dtype.itemsize
    w_bytes = params["w1_t"].dtype.itemsize

    # Generation-aware defaults: big tiles on 128 MiB-VMEM parts (v5e/v6e),
    # conservative on 64 MiB parts (v7x).
    vmem_cap = _tpu_vmem_capacity_bytes()
    big_vmem = vmem_cap >= (100 << 20)
    if tm is None:
        tm = 1024 if big_vmem else 512
    if vmem_budget_bytes is None:
        vmem_budget_bytes = (96 << 20) if big_vmem else (36 << 20)

    # Sublane packing of the activation dtype: 8 for f32, 16 for bf16, 32 for i8.
    sub = 8 * max(1, 4 // act_bytes)

    def vmem_estimate(t):
        return (2 * t * idim * act_bytes          # x    (double-buffered)
                + 2 * t * idim * act_bytes        # out  (double-buffered)
                + idim * hidden_pad * w_bytes     # W1^T (single-buffered)
                + hidden_pad * idim * w_bytes     # W2^T (single-buffered)
                + (hidden_pad + idim) * 4         # biases (f32)
                + t * hidden_pad * 4              # f32 intermediate h
                + t * idim * 4)                   # f32 accumulator for out

    # Row tile: as big as the budget allows, shrunk in 128-row steps (not halved).
    tm_eff = max(sub, min(_round_up(tm, sub), _round_up(M, sub)))
    while tm_eff > sub and vmem_estimate(tm_eff) > vmem_budget_bytes:
        tm_eff = max(sub, _round_up(max(tm_eff - 128, sub), sub))

    # Keep >= 2 grid steps when M allows, so both v7x TensorCores get work and
    # DMA/compute overlap even on single-TC parts.
    if M >= 2 * sub:
        tm_eff = min(tm_eff, _round_up(_cdiv(M, 2), sub))

    # Ragged last block: OOB rows are padded on read and masked on write.
    grid = (pl.cdiv(M, tm_eff),)

    kernel = functools.partial(_adapter_kernel, apply_relu=(mean_var == "var"))
    const = dict(pipeline_mode=pl.Buffered(1))    # grid-invariant operands

    cost = pl.CostEstimate(
        flops=4 * M * idim * hidden_pad,          # two matmuls (advisory)
        transcendentals=0,
        bytes_accessed=(2 * M * idim * act_bytes
                        + 2 * idim * hidden_pad * w_bytes
                        + (hidden_pad + idim) * 4),
    )

    vmem_limit = int(min(vmem_cap - (8 << 20),
                         max(2 * vmem_estimate(tm_eff), 32 << 20)))

    out2d = pl.pallas_call(
        kernel,
        out_shape=jax.ShapeDtypeStruct((M, idim), x.dtype),
        grid_spec=pltpu.PrefetchScalarGridSpec(
            num_scalar_prefetch=0,
            grid=grid,
            in_specs=[
                pl.BlockSpec((tm_eff, idim), lambda i: (i, 0)),               # x rows
                pl.BlockSpec((idim, hidden_pad), lambda i: (0, 0), **const),  # W1^T
                pl.BlockSpec((1, hidden_pad), lambda i: (0, 0), **const),     # b1
                pl.BlockSpec((hidden_pad, idim), lambda i: (0, 0), **const),  # W2^T
                pl.BlockSpec((1, idim), lambda i: (0, 0), **const),           # b2
            ],
            out_specs=pl.BlockSpec((tm_eff, idim), lambda i: (i, 0)),
        ),
        compiler_params=pltpu.CompilerParams(
            dimension_semantics=("parallel",),
            vmem_limit_bytes=vmem_limit,
        ),
        cost_estimate=cost,
    )(x2d, params["w1_t"], params["b1"], params["w2_t"], params["b2"])

    return out2d.reshape(orig_shape)


def adapter_single(x, w1, b1, w2, b2, *, mean_var="mean", param_dtype=None, **kw):
    """Convenience wrapper (prepares weights per call). Prefer
    prepare_adapter_params() + adapter_single_prepared() for repeated calls."""
    params = prepare_adapter_params(w1, b1, w2, b2, param_dtype=param_dtype)
    return adapter_single_prepared(x, params, mean_var=mean_var, **kw)


# ----------------------------- reference & demo -------------------------------
def _init_linear(key, out_features, in_features, dtype=jnp.float32):
    """Deterministic init mimicking nn.Linear default (uniform +-1/sqrt(in))."""
    kw, kb = jax.random.split(key)
    bound = 1.0 / (in_features ** 0.5)
    w = jax.random.uniform(kw, (out_features, in_features), dtype, -bound, bound)
    b = jax.random.uniform(kb, (out_features,), dtype, -bound, bound)
    return w, b


def adapter_single_ref(x, w1, b1, w2, b2, *, mean_var="mean"):
    h = x @ w1.T + b1
    out = h @ w2.T + b2
    if mean_var == "var":
        out = jnp.maximum(out, 0.0)
    return out


if __name__ == "__main__":
    key = jax.random.PRNGKey(0)
    k_x, k_l1, k_l2, k_x2 = jax.random.split(key, 4)

    batch, seq, idim = 2, 8, 32          # hidden = idim // 4 = 8
    hidden = idim // 4

    x = jax.random.normal(k_x, (batch, seq, idim), dtype=jnp.float32)
    w1, b1 = _init_linear(k_l1, hidden, idim)   # model1: idim -> idim//4
    w2, b2 = _init_linear(k_l2, idim, hidden)   # model2: idim//4 -> idim

    # Weight prep hoisted out of the call path (done once, reused below).
    params = prepare_adapter_params(w1, b1, w2, b2)

    # Default construction: initialization='' -> mean_var='mean' -> no relu.
    out = jax.block_until_ready(adapter_single_prepared(x, params, mean_var="mean"))
    ref = adapter_single_ref(x, w1, b1, w2, b2, mean_var="mean")
    assert out.shape == x.shape
    assert jnp.allclose(out, ref, atol=1e-5, rtol=1e-5)

    # 'var' branch (relu).
    out_var = jax.block_until_ready(adapter_single_prepared(x, params, mean_var="var"))
    ref_var = adapter_single_ref(x, w1, b1, w2, b2, mean_var="var")
    assert jnp.allclose(out_var, ref_var, atol=1e-5, rtol=1e-5)

    # Row count not a multiple of the tile -> exercises the ragged-last-block path.
    x_odd = jax.random.normal(k_x2, (3, 10, idim), dtype=jnp.float32)
    out_odd = jax.block_until_ready(adapter_single_prepared(x_odd, params))
    ref_odd = adapter_single_ref(x_odd, w1, b1, w2, b2)
    assert jnp.allclose(out_odd, ref_odd, atol=1e-5, rtol=1e-5)

    # Opt-in bf16 MXU-operand fast path (f32 I/O, f32 accumulation).
    params_bf16 = prepare_adapter_params(w1, b1, w2, b2, param_dtype=jnp.bfloat16)
    out_bf16 = jax.block_until_ready(adapter_single_prepared(x, params_bf16))
    assert jnp.allclose(out_bf16, ref, atol=3e-2, rtol=3e-2)

    # Convenience wrapper (per-call prep) still works.
    out_conv = jax.block_until_ready(adapter_single(x, w1, b1, w2, b2))
    assert jnp.allclose(out_conv, ref, atol=1e-5, rtol=1e-5)

    print("KERNEL_OK")
</pallas_src>

<mosaic_0001>
module attributes {stable_mosaic.version = 11 : i64} {
  func.func @_adapter_kernel(%arg0: i32, %arg1: memref<8x32xf32, #tpu.memory_space<vmem>>, %arg2: memref<32x128xf32, #tpu.memory_space<vmem>>, %arg3: memref<1x128xf32, #tpu.memory_space<vmem>>, %arg4: memref<128x32xf32, #tpu.memory_space<vmem>>, %arg5: memref<1x32xf32, #tpu.memory_space<vmem>>, %arg6: memref<8x32xf32, #tpu.memory_space<vmem>>) attributes {dimension_semantics = [#tpu.dimension_semantics<parallel>], iteration_bounds = array<i64: 2>, scalar_prefetch = 0 : i64, scratch_operands = 0 : i64, tpu.core_type = #tpu.core_type<tc>, window_params = [{transform_indices = @transform_0, window_bounds = array<i64: 8, 32>}, {pipeline_mode = #tpu.pipeline_mode<synchronous>, transform_indices = @transform_1, window_bounds = array<i64: 32, 128>}, {pipeline_mode = #tpu.pipeline_mode<synchronous>, transform_indices = @transform_2, window_bounds = array<i64: 1, 128>}, {pipeline_mode = #tpu.pipeline_mode<synchronous>, transform_indices = @transform_3, window_bounds = array<i64: 128, 32>}, {pipeline_mode = #tpu.pipeline_mode<synchronous>, transform_indices = @transform_4, window_bounds = array<i64: 1, 32>}, {transform_indices = @transform_5, window_bounds = array<i64: 8, 32>}]} {
    %c0 = arith.constant 0 : index
    %c0_0 = arith.constant 0 : index
    %0 = vector.load %arg1[%c0, %c0_0] : memref<8x32xf32, #tpu.memory_space<vmem>>, vector<8x32xf32>
    %c0_1 = arith.constant 0 : index
    %c0_2 = arith.constant 0 : index
    %1 = vector.load %arg2[%c0_1, %c0_2] : memref<32x128xf32, #tpu.memory_space<vmem>>, vector<32x128xf32>
    %cst = arith.constant dense<0.000000e+00> : vector<8x128xf32>
    %2 = tpu.matmul %0, %1, %cst {dimension_numbers = #tpu.dot_dimension_numbers<[1], [0], [0], [1], [0, 0, 1, 1], [], []>} : vector<8x32xf32>, vector<32x128xf32>, vector<8x128xf32> -> vector<8x128xf32>
    %c0_3 = arith.constant 0 : index
    %c0_4 = arith.constant 0 : index
    %3 = vector.load %arg3[%c0_3, %c0_4] : memref<1x128xf32, #tpu.memory_space<vmem>>, vector<1x128xf32>
    %4 = vector.broadcast %3 : vector<1x128xf32> to vector<8x128xf32>
    %5 = arith.addf %2, %4 : vector<8x128xf32>
    %c0_5 = arith.constant 0 : index
    %c0_6 = arith.constant 0 : index
    %6 = vector.load %arg4[%c0_5, %c0_6] : memref<128x32xf32, #tpu.memory_space<vmem>>, vector<128x32xf32>
    %cst_7 = arith.constant dense<0.000000e+00> : vector<8x32xf32>
    %7 = tpu.matmul %5, %6, %cst_7 {dimension_numbers = #tpu.dot_dimension_numbers<[1], [0], [0], [1], [0, 0, 1, 1], [], []>} : vector<8x128xf32>, vector<128x32xf32>, vector<8x32xf32> -> vector<8x32xf32>
    %c0_8 = arith.constant 0 : index
    %c0_9 = arith.constant 0 : index
    %8 = vector.load %arg5[%c0_8, %c0_9] : memref<1x32xf32, #tpu.memory_space<vmem>>, vector<1x32xf32>
    %9 = vector.broadcast %8 : vector<1x32xf32> to vector<8x32xf32>
    %10 = arith.addf %7, %9 : vector<8x32xf32>
    %c0_10 = arith.constant 0 : index
    %c0_11 = arith.constant 0 : index
    %11 = vector.load %arg6[%c0_10, %c0_11] : memref<8x32xf32, #tpu.memory_space<vmem>>, vector<8x32xf32>
    tpu.vector_store %arg6[%c0_10, %c0_11], %10 {strides = array<i32>} : memref<8x32xf32, #tpu.memory_space<vmem>>, vector<8x32xf32>,
    return
  }
  func.func @transform_0(%arg0: i32) -> (i32, i32) {
    %c0_i32 = arith.constant 0 : i32
    %c0_i32_0 = arith.constant 0 : i32
    return %arg0, %c0_i32 : i32, i32
  }
  func.func @transform_1(%arg0: i32) -> (i32, i32) {
    %c0_i32 = arith.constant 0 : i32
    %c0_i32_0 = arith.constant 0 : i32
    %c0_i32_1 = arith.constant 0 : i32
    return %c0_i32, %c0_i32_0 : i32, i32
  }
  func.func @transform_2(%arg0: i32) -> (i32, i32) {
    %c0_i32 = arith.constant 0 : i32
    %c0_i32_0 = arith.constant 0 : i32
    %c0_i32_1 = arith.constant 0 : i32
    return %c0_i32, %c0_i32_0 : i32, i32
  }
  func.func @transform_3(%arg0: i32) -> (i32, i32) {
    %c0_i32 = arith.constant 0 : i32
    %c0_i32_0 = arith.constant 0 : i32
    %c0_i32_1 = arith.constant 0 : i32
    return %c0_i32, %c0_i32_0 : i32, i32
  }
  func.func @transform_4(%arg0: i32) -> (i32, i32) {
    %c0_i32 = arith.constant 0 : i32
    %c0_i32_0 = arith.constant 0 : i32
    %c0_i32_1 = arith.constant 0 : i32
    return %c0_i32, %c0_i32_0 : i32, i32
  }
  func.func @transform_5(%arg0: i32) -> (i32, i32) {
    %c0_i32 = arith.constant 0 : i32
    %c0_i32_0 = arith.constant 0 : i32
    return %arg0, %c0_i32 : i32, i32
  }
}

</mosaic_0001>

<bundles_post_ra>
// kernel: tpu_custom_call.1
= control target key start
LH: loop header
LB: loop body
LE: loop exit
PB: predicated region body
PF: predicated region fallthrough
CT: control target
= control target key end

     0   :  { %10 = vsyncpa [#allocation3], 0  ;;  %s668_s0 = inlined_call_operand.vmem [shape: f32[16,32], index: 0, kind: input, shape index: {}]   ;;  %s669_s1 = inlined_call_operand.vmem [shape: f32[32,128], index: 1, kind: input, shape index: {}]   ;;  %s670_s2 = inlined_call_operand.vmem [shape: f32[1,128], index: 2, kind: input, shape index: {}]   ;;  %s671_s3 = inlined_call_operand.vmem [shape: f32[128,32], index: 3, kind: input, shape index: {}]   ;;  %s672_s4 = inlined_call_operand.vmem [shape: f32[1,32], index: 4, kind: input, shape index: {}]   ;;  %s673_s5 = inlined_call_operand.hbm [shape: f32[16,32], index: 5, kind: output, shape index: {}]  }
   0x1   :  { %12 = vsyncpa [#allocation3 + $0x1], 0  ;;  %s515_s18 = smov 0   ;;  %s517_s19 = smov 0  }
   0x2   :  { %s519_s20 = smov 0   ;;  %s521_s21 = smov 0  }
   0x3 LB: > { %s536_s22 = sadd.s32 4294967295, %s483_s21   ;;  %s369_s23 = sadd.s32 4294967294, %s483_s21   ;;  %s483_s21 = sphi %s521_s21, %s679_s21   ;;  %s479_s20 = sphi %s519_s20, %s678_s20   ;;  %s475_s19 = sphi %s517_s19, %s677_s19   ;;  %s471_s18 = sphi %s515_s18, %s676_s18  }
   0x4   : > { %s540_s24 = sadd.s32 1, %s483_s21   ;;  %s135_s25 = sadd.s32 1, %s479_s20 }
   0x5   : > { %s132_s26 = ssub.s32 %s483_s21, %s540_s24  ;;  %p145_p0 = scmp.ne.s32.totalorder %s479_s20, %s475_s19 }
   0x6   : > { %p133_p1 = scmp.eq.s32.totalorder %s132_s26, 0  ;;  %p146_p2 = scmp.eq.s32.totalorder %s536_s22, 1 }
   0x7   : > { %p151_p3 = scmp.ne.s32.totalorder %s475_s19, %s471_s18  ;;  %p152_p4 = scmp.eq.s32.totalorder %s369_s23, 1 }
   0x8   : > { %s551_s27 = scalar_select %p133_p1, %s479_s20, %s135_s25  }
   0x9   : > { %p553_p5 = por %p146_p2, %p145_p0  ;;  %p557_p6 = por %p152_p4, %p151_p3 }
   0xa   : > { %p372_p7 = scmp.ge.s32.totalorder %s483_s21, 1  ;;  %p189_p8 = scmp.lt.s32.totalorder %s483_s21, 3 }
   0xc   : > { %p190_p9 = pnand %p372_p7, %p189_p8 }
   0xd   : > { %p216_p10 = scmp.lt.s32.totalorder (!%p190_p9), %s536_s22, 1  ;;  %s377_s6 = sshll.u32 (!%p190_p9), %s536_s22, 3 }
   0xe   : > { %193 = sbr.rel (%p190_p9) target bundleno = 286 (0x11e), region = 40  ;;  %s305_s9 = scalar_lea.hbm (!%p190_p9), %s673_s5, %s377_s6 }
   0xf   : > { %s309_s14 = sshll.u32 (!%p190_p9), %s305_s9, 4  ;;  %s441_s25 = scalar_lea.hbm (!%p190_p9), %s673_s5, 16  ;;  %s310_s14 = int_to_ptr.hbm [resolvable:$true] %s309_s14 }
  0x13   : > { %v224_v0 = vld [vmem:[%s669_s1 + $0x18] sm:$0xff]  ;;  %v223_v1 = vld [vmem:[%s669_s1 + $0x10] sm:$0xff]  ;;  %v222_v4 = vld [vmem:[%s669_s1 + $0x8] sm:$0xff]  ;;  %s217_s15 = scalar_select %p216_p10, %s536_s22, 1  ;;  %vm229_vm0 = vcmask 261120  }
  0x14   : > { %245 = vmatpush.msra.mxu0 %v224_v0  ;;  %v268_v2 = vld [vmem:[%s671_s3 + $0x78] sm:$0xff]  ;;  %v267_v3 = vld [vmem:[%s671_s3 + $0x70] sm:$0xff]  ;;  %v266_v5 = vld [vmem:[%s671_s3 + $0x68] sm:$0xff]  ;;  %s435_s22 = sshra.s32 %s310_s14, 4  ;;  %s436_s22 = int_to_ptr.hbm [resolvable:$true] %s435_s22 }
  0x15   : > { %273 = vmatpush.msra.mxu1 %v268_v2  ;;  %v221_v6 = vld [vmem:[%s669_s1] sm:$0xff]  ;;  %s374_s26 = sshll.u32 %s217_s15, 3  ;;  %v264_v9 = vld [vmem:[%s671_s3 + $0x58] sm:$0xff]  ;;  %v263_v10 = vld [vmem:[%s671_s3 + $0x50] sm:$0xff]  ;;  %s437_s16 = scalar_lea.hbm %s436_s22, 8 }
  0x16   : > { %246 = vmatpush.msra.mxu0 %v223_v1  ;;  %s219_s7 = scalar_lea.vmem %s668_s0, %s374_s26  ;;  %v265_v7 = vld [vmem:[%s671_s3 + $0x60] sm:$0xff]  ;;  %v262_v11 = vld [vmem:[%s671_s3 + $0x48] sm:$0xff]  ;;  %v260_v13 = vld [vmem:[%s671_s3 + $0x38] sm:$0xff]  ;;  %s213_s26 = sand.u32 1, %s475_s19  }
  0x17   : > { %274 = vmatpush.msra.mxu1 %v267_v3  ;;  %v220_v8 = vld [vmem:[%s219_s7] sm:$0xff]  ;;  %v259_v14 = vld [vmem:[%s671_s3 + $0x30] sm:$0xff]  ;;  %v258_v15 = vld [vmem:[%s671_s3 + $0x28] sm:$0xff]  ;;  %s373_s30 = sshll.u32 %s213_s26, 3  ;;  %s295_s15 = scalar_lea.sflag [#allocation3], %s213_s26 }
  0x18   : > { %247 = vmatpush.msra.mxu0 %v222_v4  ;;  %v261_v12 = vld [vmem:[%s671_s3 + $0x40] sm:$0xff]  ;;  %v256_v17 = vld [vmem:[%s671_s3 + $0x18] sm:$0xff]  ;;  %v255_v18 = vld [vmem:[%s671_s3 + $0x10] sm:$0xff]  ;;  %s215_s12 = scalar_lea.vmem [#allocation2], %s373_s30  ;;  %p438_p11 = scmp.ne.s32.totalorder %s436_s22, %s437_s16 }
  0x19   : > { %275 = vmatpush.msra.mxu1 %v266_v5  ;;  %v257_v16 = vld [vmem:[%s671_s3 + $0x20] sm:$0xff]  ;;  %v254_v19 = vld [vmem:[%s671_s3 + $0x8] sm:$0xff]  ;;  %s307_s13 = sshll.u32 %s215_s12, 4  ;;  %p442_p0 = scmp.lt.s32.totalorder %s436_s22, %s673_s5  ;;  %s308_s13 = int_to_ptr.vmem [resolvable:$true] %s307_s13 }
  0x1a   : > { %248 = vmatpush.msra.mxu0 %v221_v6  ;;  %v253_v20 = vld [vmem:[%s671_s3] sm:$0xff]  ;;  %p439_p12 = pnand %p438_p11, %p553_p5  ;;  %p443_p1 = scmp.lt.s32.totalorder %s441_s25, %s437_s16 }
  0x1b   : > { %375 = vmatmul.msk.f32.vlgmr.msra.gmra.mxu0 %vm229_vm0, %v220_v8  ;;  %276 = vmatpush.msra.mxu1 %v265_v7  ;;  %v419_v21 = vld [vmem:[%s670_s2] ss:$0 sm:$0xff] }
  0x1c   : > { %v420_v24 = vld [vmem:[%s672_s4] ss:$0 sm:$0xff]  ;;  %p440_p13 = pneg %p439_p12  ;;  %p444_p2 = por %p443_p1, %p442_p0 }
  0x1d   : > { %277 = vmatpush.msra.mxu1 %v264_v9 }
  0x1e   : > { %p445_p3 = pnand %p444_p2, %p440_p13 }
  0x1f   : > { %278 = vmatpush.msra.mxu1 %v263_v10 }
  0x21   : > { %279 = vmatpush.msra.mxu1 %v262_v11 }
  0x23   : > { %280 = vmatpush.msra.mxu1 %v261_v12 }
  0x25   : > { %281 = vmatpush.msra.mxu1 %v260_v13 }
  0x27   : > { %282 = vmatpush.msra.mxu1 %v259_v14 }
  0x29   : > { %283 = vmatpush.msra.mxu1 %v258_v15 }
  0x2b   : > { %284 = vmatpush.msra.mxu1 %v257_v16 }
  0x2d   : > { %285 = vmatpush.msra.mxu1 %v256_v17 }
  0x2f   : > { %286 = vmatpush.msra.mxu1 %v255_v18 }
  0x31   : > { %287 = vmatpush.msra.mxu1 %v254_v19 }
  0x33   : > { %288 = vmatpush.msra.mxu1 %v253_v20 }
  0x98   : > { %v250_v22 = vpop.f32.mrf.mxu0 }
  0x99   : > { %v251_v23 = vadd.f32 %v419_v21, %v250_v22 }
  0x9b   : > { %289 = vmatmul.f32.vlgmr.msra.gmra.mxu1 %v251_v23 }
 0x118   : > { %v290_v25 = vpop.f32.mrf.mxu1 }
 0x119   : > { %v291_v26 = vadd.f32 %v420_v24, %v290_v25 }
 0x11b   : > { %293 = vst.msk [vmem:[%s215_s12] sm:$0xff] %vm229_vm0, %v291_v26 }
 0x11c   : > { %448 = shalt.err (!%p445_p3)
}
 0x11d   : > { %380 = dma.vmem_to_hbm [thread:$0]  (%p553_p5), %s308_s13, 128, %s310_s14, %s295_s15  }
 0x11e PF: > { %p386_p4 = scmp.ge.s32.totalorder %s483_s21, 2  ;;  %s321_s26 = sand.u32 1, %s471_s18  }
 0x11f   : > { %s322_s7 = scalar_lea.sflag [#allocation3], %s321_s26 }
 0x120   : > { %p383_p7 = pnand %p386_p4, %p557_p6 }
 0x122   : > { %p384_p8 = pneg %p383_p7 }
 0x124   : > { %466 = dma.done.wait (%p384_p8), %s322_s7, 128  }
 0x125   : > { %468 = vsyncadd (%p384_p8), %s322_s7, 4294967168  ;;  %p15_p9 = scmp.ge.s32.totalorder %s540_s24, 4   ;;  %s676_s18 = smov %s475_s19 }
 0x126   : > { %s677_s19 = smov %s479_s20  ;;  %s678_s20 = smov %s551_s27 }
 0x127   : > { %s679_s21 = smov %s540_s24  ;;  %17 = sbr.rel (!%p15_p9) target bundleno = 3 (0x3), region = 75 }
 0x12c   :  { %328 = vsyncpa [#allocation3], 1 }
 0x12d   :  { %330 = vsyncpa [#allocation3 + $0x1], 1 }

</bundles_post_ra>
